<compile_context>
chip_gen: v7x
topology: tpu7x:2x2x1
jax: 0.10.0
libtpu: 0.0.40
codegen_flags: <defaults>
</compile_context>

<pallas_src>
import math
import jax
import jax.numpy as jnp
from jax import lax
from jax.experimental import pallas as pl
from jax.experimental.pallas import tpu as pltpu


LN_EPS = 1e-12  # matches the spec module's LayerNorm default (TF-style, eps inside sqrt)


def _layernorm(x, gamma, beta, eps=LN_EPS):
    u = jnp.mean(x, axis=-1, keepdims=True)
    xc = x - u
    s = jnp.mean(xc * xc, axis=-1, keepdims=True)
    return gamma * (xc * lax.rsqrt(s + eps)) + beta


# ---------------------------------------------------------------------------
# Single fused kernel: one grid step = one batch element, everything in VMEM.
# ---------------------------------------------------------------------------
def _make_fused_kernel(n_head, compute_dtype):
    def kernel(x_ref, g1_ref, b1_ref,
               wqkv_ref, bqkv_ref,
               wo_ref, bo_ref,
               g2_ref, b2_ref,
               wfc_ref, bfc_ref,
               wpr_ref, bpr_ref,
               y_ref,
               attn_ref):                               # (S, D) f32 VMEM scratch
        cd = compute_dtype
        xb = x_ref[0]                                   # (S, D) float32
        S, D = xb.shape
        hd = D // n_head
        scale = 1.0 / math.sqrt(hd)

        def mm(a, w):
            # weights already arrive in the compute dtype (bf16) -> no in-kernel
            # full-weight-tile casts; f32 accumulation on the MXU.
            return jnp.dot(a.astype(cd), w, preferred_element_type=jnp.float32)

        # ---- ln_1 + fused QKV projection (one (S,D)x(D,3D) matmul) ----
        h = _layernorm(xb, g1_ref[0], b1_ref[0])
        qkv = mm(h, wqkv_ref[...]) + bqkv_ref[0]        # (S, 3D) float32

        # ---- multi-head attention: per-head outputs written to the (S,D) scratch ----
        # NOTE: static loop keeps the demo compile-safe; for H>=12 convert to
        # lax.fori_loop over 128-lane-aligned head pairs (review items 3/4).
        for hh in range(n_head):
            qh = qkv[:, hh * hd:(hh + 1) * hd]                      # (S, hd)
            kh = qkv[:, D + hh * hd:D + (hh + 1) * hd]
            vh = qkv[:, 2 * D + hh * hd:2 * D + (hh + 1) * hd]
            s = lax.dot_general(qh.astype(cd), kh.astype(cd),
                                (((1,), (1,)), ((), ())),
                                preferred_element_type=jnp.float32) * scale  # (S, S)
            m = jnp.max(s, axis=-1, keepdims=True)
            e = jnp.exp(s - m)                                       # f32 (v5e-safe)
            p = e * pl.reciprocal(jnp.sum(e, axis=-1, keepdims=True), approx=True)
            attn_ref[:, hh * hd:(hh + 1) * hd] = jnp.dot(
                p.astype(cd), vh.astype(cd), preferred_element_type=jnp.float32)

        # ---- ONE full-K out-projection matmul + bias + residual ----
        x1 = xb + mm(attn_ref[...], wo_ref[...]) + bo_ref[0]

        # ---- ln_2 + MLP (c_fc -> QuickGELU -> c_proj) + residual ----
        h2 = _layernorm(x1, g2_ref[0], b2_ref[0])
        h1 = mm(h2, wfc_ref[...]) + bfc_ref[0]          # (S, 4D) f32
        g = h1 * jax.nn.sigmoid(1.702 * h1)             # QuickGELU (f32, VPU/EUP)
        y_ref[0] = (x1 + mm(g, wpr_ref[...]) + bpr_ref[0]).astype(y_ref.dtype)

    return kernel


# ---------------------------------------------------------------------------
# Wrappers
# ---------------------------------------------------------------------------
def residual_attention_block_bsd(x_bsd, params, n_head, compute_dtype=jnp.bfloat16):
    """x_bsd: (B, S, D) float32.  Matmuls run in `compute_dtype` with f32 accumulation."""
    B, S, D = x_bsd.shape
    cd = compute_dtype

    # Cast the big weight matrices to the compute dtype ONCE here (in production,
    # keep them stored in bf16 in HBM so this is a no-op).
    w_qkv = params["w_qkv"].astype(cd)
    wo = params["wo"].astype(cd)
    w_fc = params["w_fc"].astype(cd)
    w_pr = params["w_proj"].astype(cd)

    batch_spec = pl.BlockSpec((1, S, D), lambda b: (b, 0, 0))

    def const(shape):
        return pl.BlockSpec(shape, lambda b, _n=len(shape): (0,) * _n)

    # Scoped-VMEM budget from the actual resident tile sizes (compute-dtype weights,
    # default double-buffering) + intermediates, clamped to a safe range.
    wbytes = jnp.finfo(cd).bits // 8
    weight_bytes = (D * 3 * D + D * D + D * 4 * D + 4 * D * D) * wbytes
    bias_bytes = (3 * D + D + 4 * D + D + D + D + D + D) * 4
    act_bytes = 4 * (2 * 2 * S * D                       # x in + y out (double-buffered)
                     + S * 3 * D + S * 4 * D + S * S + S * D)  # qkv, mlp hidden, scores, attn
    est = (2 * weight_bytes + 2 * bias_bytes + act_bytes) * 5 // 4
    vmem_limit = int(min(max(est, 16 << 20), 64 << 20))

    kernel = _make_fused_kernel(n_head, cd)
    return pl.pallas_call(
        kernel,
        out_shape=jax.ShapeDtypeStruct((B, S, D), x_bsd.dtype),
        grid=(B,),
        in_specs=[batch_spec,
                  const((1, D)), const((1, D)),          # ln_1
                  const((D, 3 * D)), const((1, 3 * D)),  # packed QKV
                  const((D, D)), const((1, D)),          # out-proj
                  const((1, D)), const((1, D)),          # ln_2
                  const((D, 4 * D)), const((1, 4 * D)),  # c_fc
                  const((4 * D, D)), const((1, D))],     # c_proj
        out_specs=batch_spec,
        scratch_shapes=[pltpu.VMEM((S, D), jnp.float32)],  # concatenated head outputs
        compiler_params=pltpu.CompilerParams(
            dimension_semantics=("parallel",),           # shard batch over v7x cores
            vmem_limit_bytes=vmem_limit),
    )(x_bsd, params["ln1_g"], params["ln1_b"],
      w_qkv, params["b_qkv"],
      wo, params["bo"],
      params["ln2_g"], params["ln2_b"],
      w_fc, params["b_fc"],
      w_pr, params["b_proj"])


def residual_attention_block(x_sbd, params, n_head, compute_dtype=jnp.bfloat16):
    """x_sbd: (S, B, D) float32 — PyTorch nn.MultiheadAttention layout."""
    x = jnp.transpose(x_sbd, (1, 0, 2))                  # (B, S, D)
    y = residual_attention_block_bsd(x, params, n_head, compute_dtype)
    return jnp.transpose(y, (1, 0, 2))                   # back to (S, B, D)


# ---------------------------------------------------------------------------
# Pure-JAX reference mirroring the same numerics (bf16 matmuls, f32 accumulation)
# ---------------------------------------------------------------------------
def reference_block(x_sbd, params, n_head, compute_dtype=jnp.bfloat16):
    cd = compute_dtype

    def mm(a, w):
        return jnp.dot(a.astype(cd), w.astype(cd), preferred_element_type=jnp.float32)

    S, B, D = x_sbd.shape
    hd = D // n_head
    x = jnp.transpose(x_sbd, (1, 0, 2))
    h = _layernorm(x, params["ln1_g"][0], params["ln1_b"][0])
    qkv = mm(h, params["w_qkv"]) + params["b_qkv"][0]
    q, k, v = qkv[..., :D], qkv[..., D:2 * D], qkv[..., 2 * D:]
    split = lambda t: jnp.transpose(t.reshape(B, S, n_head, hd), (0, 2, 1, 3))
    qh, kh, vh = split(q), split(k), split(v)
    s = jnp.einsum("bhqd,bhkd->bhqk", qh.astype(cd), kh.astype(cd),
                   preferred_element_type=jnp.float32) / math.sqrt(hd)
    p = jax.nn.softmax(s, axis=-1)
    oh = jnp.einsum("bhqk,bhkd->bhqd", p.astype(cd), vh.astype(cd),
                    preferred_element_type=jnp.float32)
    attn = jnp.transpose(oh, (0, 2, 1, 3)).reshape(B, S, D)
    x1 = x + mm(attn, params["wo"]) + params["bo"][0]
    h2 = _layernorm(x1, params["ln2_g"][0], params["ln2_b"][0])
    h1 = mm(h2, params["w_fc"]) + params["b_fc"][0]
    g = h1 * jax.nn.sigmoid(1.702 * h1)
    y = x1 + mm(g, params["w_proj"]) + params["b_proj"][0]
    return jnp.transpose(y, (1, 0, 2))


def init_params(key, d_model, n_head):
    D = d_model
    ks = jax.random.split(key, 8)
    # nn.MultiheadAttention: in_proj_weight (3D, D), out_proj Linear(D, D)
    in_proj_w = 0.02 * jax.random.normal(ks[0], (3 * D, D), jnp.float32)
    in_proj_b = 0.02 * jax.random.normal(ks[1], (3 * D,), jnp.float32)
    out_w = 0.02 * jax.random.normal(ks[2], (D, D), jnp.float32)
    out_b = 0.02 * jax.random.normal(ks[3], (D,), jnp.float32)
    fc_w = 0.02 * jax.random.normal(ks[4], (4 * D, D), jnp.float32)     # nn.Linear(D, 4D)
    fc_b = 0.02 * jax.random.normal(ks[5], (4 * D,), jnp.float32)
    pr_w = 0.02 * jax.random.normal(ks[6], (D, 4 * D), jnp.float32)     # nn.Linear(4D, D)
    pr_b = 0.02 * jax.random.normal(ks[7], (D,), jnp.float32)
    # Kernels right-multiply (y = x @ W.T + b) -> store transposed weights.
    # QKV packed: columns [Wq.T | Wk.T | Wv.T] so the kernel does ONE (S,D)x(D,3D) matmul.
    return {
        "ln1_g": jnp.ones((1, D), jnp.float32), "ln1_b": jnp.zeros((1, D), jnp.float32),
        "ln2_g": jnp.ones((1, D), jnp.float32), "ln2_b": jnp.zeros((1, D), jnp.float32),
        "w_qkv": in_proj_w.T, "b_qkv": in_proj_b[None, :],
        "wo": out_w.T, "bo": out_b[None, :],
        "w_fc": fc_w.T, "b_fc": fc_b[None, :],
        "w_proj": pr_w.T, "b_proj": pr_b[None, :],
    }


if __name__ == "__main__":
    S, B, D, H = 8, 2, 32, 4          # seq=8, batch=2, d_model=32, n_head=4
    key = jax.random.PRNGKey(0)
    kx, kp = jax.random.split(key)
    x = jax.random.normal(kx, (S, B, D), jnp.float32)   # PyTorch MHA layout (S, B, D)
    params = init_params(kp, D, H)

    out = jax.block_until_ready(residual_attention_block(x, params, H))
    ref = jax.block_until_ready(reference_block(x, params, H))

    assert out.shape == (S, B, D)
    max_err = float(jnp.max(jnp.abs(out - ref)))
    assert jnp.allclose(out, ref, atol=2e-3, rtol=2e-3), \
        f"Pallas output mismatch vs reference (max|diff|={max_err})"

    print("KERNEL_OK")
</pallas_src>

<mosaic_0001>
module attributes {stable_mosaic.version = 11 : i64} {
  func.func @kernel(%arg0: i32, %arg1: memref<1x8x32xf32, #tpu.memory_space<vmem>>, %arg2: memref<1x32xf32, #tpu.memory_space<vmem>>, %arg3: memref<1x32xf32, #tpu.memory_space<vmem>>, %arg4: memref<32x96xbf16, #tpu.memory_space<vmem>>, %arg5: memref<1x96xf32, #tpu.memory_space<vmem>>, %arg6: memref<32x32xbf16, #tpu.memory_space<vmem>>, %arg7: memref<1x32xf32, #tpu.memory_space<vmem>>, %arg8: memref<1x32xf32, #tpu.memory_space<vmem>>, %arg9: memref<1x32xf32, #tpu.memory_space<vmem>>, %arg10: memref<32x128xbf16, #tpu.memory_space<vmem>>, %arg11: memref<1x128xf32, #tpu.memory_space<vmem>>, %arg12: memref<128x32xbf16, #tpu.memory_space<vmem>>, %arg13: memref<1x32xf32, #tpu.memory_space<vmem>>, %arg14: memref<1x8x32xf32, #tpu.memory_space<vmem>>, %arg15: memref<8x32xf32, #tpu.memory_space<vmem>>) attributes {dimension_semantics = [#tpu.dimension_semantics<parallel>], iteration_bounds = array<i64: 2>, scalar_prefetch = 0 : i64, scratch_operands = 1 : i64, tpu.core_type = #tpu.core_type<tc>, window_params = [{transform_indices = @transform_0, window_bounds = array<i64: 1, 8, 32>}, {pipeline_mode = #tpu.pipeline_mode<synchronous>, transform_indices = @transform_1, window_bounds = array<i64: 1, 32>}, {pipeline_mode = #tpu.pipeline_mode<synchronous>, transform_indices = @transform_2, window_bounds = array<i64: 1, 32>}, {pipeline_mode = #tpu.pipeline_mode<synchronous>, transform_indices = @transform_3, window_bounds = array<i64: 32, 96>}, {pipeline_mode = #tpu.pipeline_mode<synchronous>, transform_indices = @transform_4, window_bounds = array<i64: 1, 96>}, {pipeline_mode = #tpu.pipeline_mode<synchronous>, transform_indices = @transform_5, window_bounds = array<i64: 32, 32>}, {pipeline_mode = #tpu.pipeline_mode<synchronous>, transform_indices = @transform_6, window_bounds = array<i64: 1, 32>}, {pipeline_mode = #tpu.pipeline_mode<synchronous>, transform_indices = @transform_7, window_bounds = array<i64: 1, 32>}, {pipeline_mode = #tpu.pipeline_mode<synchronous>, transform_indices = @transform_8, window_bounds = array<i64: 1, 32>}, {pipeline_mode = #tpu.pipeline_mode<synchronous>, transform_indices = @transform_9, window_bounds = array<i64: 32, 128>}, {pipeline_mode = #tpu.pipeline_mode<synchronous>, transform_indices = @transform_10, window_bounds = array<i64: 1, 128>}, {pipeline_mode = #tpu.pipeline_mode<synchronous>, transform_indices = @transform_11, window_bounds = array<i64: 128, 32>}, {pipeline_mode = #tpu.pipeline_mode<synchronous>, transform_indices = @transform_12, window_bounds = array<i64: 1, 32>}, {transform_indices = @transform_13, window_bounds = array<i64: 1, 8, 32>}]} {
    %c0 = arith.constant 0 : index
    %c0_0 = arith.constant 0 : index
    %c0_1 = arith.constant 0 : index
    %0 = vector.load %arg1[%c0, %c0_0, %c0_1] : memref<1x8x32xf32, #tpu.memory_space<vmem>>, vector<1x8x32xf32>
    %1 = vector.shape_cast %0 : vector<1x8x32xf32> to vector<8x32xf32>
    %c0_2 = arith.constant 0 : index
    %c0_3 = arith.constant 0 : index
    %2 = vector.load %arg2[%c0_2, %c0_3] : memref<1x32xf32, #tpu.memory_space<vmem>>, vector<1x32xf32>
    %3 = vector.shape_cast %2 : vector<1x32xf32> to vector<32xf32>
    %c0_4 = arith.constant 0 : index
    %c0_5 = arith.constant 0 : index
    %4 = vector.load %arg3[%c0_4, %c0_5] : memref<1x32xf32, #tpu.memory_space<vmem>>, vector<1x32xf32>
    %5 = vector.shape_cast %4 : vector<1x32xf32> to vector<32xf32>
    %cst = arith.constant dense<0.000000e+00> : vector<8xf32>
    %6 = vector.multi_reduction <add>, %1, %cst [1] : vector<8x32xf32> to vector<8xf32>
    %7 = vector.shape_cast %6 : vector<8xf32> to vector<8x1xf32>
    %cst_6 = arith.constant 3.200000e+01 : f32
    %8 = vector.broadcast %cst_6 : f32 to vector<8x1xf32>
    %9 = arith.divf %7, %8 : vector<8x1xf32>
    %10 = vector.broadcast %9 : vector<8x1xf32> to vector<8x32xf32>
    %11 = arith.subf %1, %10 : vector<8x32xf32>
    %12 = arith.mulf %11, %11 : vector<8x32xf32>
    %cst_7 = arith.constant dense<0.000000e+00> : vector<8xf32>
    %13 = vector.multi_reduction <add>, %12, %cst_7 [1] : vector<8x32xf32> to vector<8xf32>
    %14 = vector.shape_cast %13 : vector<8xf32> to vector<8x1xf32>
    %cst_8 = arith.constant 3.200000e+01 : f32
    %15 = vector.broadcast %cst_8 : f32 to vector<8x1xf32>
    %16 = arith.divf %14, %15 : vector<8x1xf32>
    %cst_9 = arith.constant 9.99999996E-13 : f32
    %17 = vector.broadcast %cst_9 : f32 to vector<8x1xf32>
    %18 = arith.addf %16, %17 : vector<8x1xf32>
    %19 = math.rsqrt %18 : vector<8x1xf32>
    %20 = vector.broadcast %19 : vector<8x1xf32> to vector<8x32xf32>
    %21 = arith.mulf %11, %20 : vector<8x32xf32>
    %22 = vector.shape_cast %3 : vector<32xf32> to vector<1x32xf32>
    %23 = vector.broadcast %22 : vector<1x32xf32> to vector<8x32xf32>
    %24 = arith.mulf %23, %21 : vector<8x32xf32>
    %25 = vector.shape_cast %5 : vector<32xf32> to vector<1x32xf32>
    %26 = vector.broadcast %25 : vector<1x32xf32> to vector<8x32xf32>
    %27 = arith.addf %24, %26 : vector<8x32xf32>
    %c0_10 = arith.constant 0 : index
    %c0_11 = arith.constant 0 : index
    %28 = vector.load %arg4[%c0_10, %c0_11] : memref<32x96xbf16, #tpu.memory_space<vmem>>, vector<32x96xbf16>
    %29 = arith.truncf %27 : vector<8x32xf32> to vector<8x32xbf16>
    %cst_12 = arith.constant dense<0.000000e+00> : vector<8x96xf32>
    %30 = tpu.matmul %29, %28, %cst_12 {dimension_numbers = #tpu.dot_dimension_numbers<[1], [0], [0], [1], [0, 0, 1, 1], [], []>} : vector<8x32xbf16>, vector<32x96xbf16>, vector<8x96xf32> -> vector<8x96xf32>
    %c0_13 = arith.constant 0 : index
    %c0_14 = arith.constant 0 : index
    %31 = vector.load %arg5[%c0_13, %c0_14] : memref<1x96xf32, #tpu.memory_space<vmem>>, vector<1x96xf32>
    %32 = vector.shape_cast %31 : vector<1x96xf32> to vector<96xf32>
    %33 = vector.shape_cast %32 : vector<96xf32> to vector<1x96xf32>
    %34 = vector.broadcast %33 : vector<1x96xf32> to vector<8x96xf32>
    %35 = arith.addf %30, %34 : vector<8x96xf32>
    %36 = vector.extract_strided_slice %35 {offsets = [0, 0], sizes = [8, 8], strides = [1, 1]} : vector<8x96xf32> to vector<8x8xf32>
    %37 = vector.extract_strided_slice %35 {offsets = [0, 32], sizes = [8, 8], strides = [1, 1]} : vector<8x96xf32> to vector<8x8xf32>
    %38 = vector.extract_strided_slice %35 {offsets = [0, 64], sizes = [8, 8], strides = [1, 1]} : vector<8x96xf32> to vector<8x8xf32>
    %39 = arith.truncf %36 : vector<8x8xf32> to vector<8x8xbf16>
    %40 = arith.truncf %37 : vector<8x8xf32> to vector<8x8xbf16>
    %cst_15 = arith.constant dense<0.000000e+00> : vector<8x8xf32>
    %41 = tpu.matmul %39, %40, %cst_15 {dimension_numbers = #tpu.dot_dimension_numbers<[1], [1], [0], [0], [0, 0, 1, 0], [], []>} : vector<8x8xbf16>, vector<8x8xbf16>, vector<8x8xf32> -> vector<8x8xf32>
    %cst_16 = arith.constant 0.353553385 : f32
    %42 = vector.broadcast %cst_16 : f32 to vector<8x8xf32>
    %43 = arith.mulf %41, %42 : vector<8x8xf32>
    %cst_17 = arith.constant dense<0xFF800000> : vector<8xf32>
    %44 = vector.multi_reduction <maximumf>, %43, %cst_17 [1] : vector<8x8xf32> to vector<8xf32>
    %45 = vector.shape_cast %44 : vector<8xf32> to vector<8x1xf32>
    %46 = vector.broadcast %45 : vector<8x1xf32> to vector<8x8xf32>
    %47 = arith.subf %43, %46 : vector<8x8xf32>
    %48 = math.exp %47 : vector<8x8xf32>
    %cst_18 = arith.constant dense<0.000000e+00> : vector<8xf32>
    %49 = vector.multi_reduction <add>, %48, %cst_18 [1] : vector<8x8xf32> to vector<8xf32>
    %50 = vector.shape_cast %49 : vector<8xf32> to vector<8x1xf32>
    %51 = tpu.reciprocal %50 {approx = true} : vector<8x1xf32> -> vector<8x1xf32>
    %52 = vector.broadcast %51 : vector<8x1xf32> to vector<8x8xf32>
    %53 = arith.mulf %48, %52 : vector<8x8xf32>
    %54 = arith.truncf %53 : vector<8x8xf32> to vector<8x8xbf16>
    %55 = arith.truncf %38 : vector<8x8xf32> to vector<8x8xbf16>
    %cst_19 = arith.constant dense<0.000000e+00> : vector<8x8xf32>
    %56 = tpu.matmul %54, %55, %cst_19 {dimension_numbers = #tpu.dot_dimension_numbers<[1], [0], [0], [1], [0, 0, 1, 1], [], []>} : vector<8x8xbf16>, vector<8x8xbf16>, vector<8x8xf32> -> vector<8x8xf32>
    %c0_20 = arith.constant 0 : index
    %c0_21 = arith.constant 0 : index
    %57 = vector.load %arg15[%c0_20, %c0_21] : memref<8x32xf32, #tpu.memory_space<vmem>>, vector<8x8xf32>
    tpu.vector_store %arg15[%c0_20, %c0_21], %56 {strides = array<i32>} : memref<8x32xf32, #tpu.memory_space<vmem>>, vector<8x8xf32>,
    %58 = vector.extract_strided_slice %35 {offsets = [0, 8], sizes = [8, 8], strides = [1, 1]} : vector<8x96xf32> to vector<8x8xf32>
    %59 = vector.extract_strided_slice %35 {offsets = [0, 40], sizes = [8, 8], strides = [1, 1]} : vector<8x96xf32> to vector<8x8xf32>
    %60 = vector.extract_strided_slice %35 {offsets = [0, 72], sizes = [8, 8], strides = [1, 1]} : vector<8x96xf32> to vector<8x8xf32>
    %61 = arith.truncf %58 : vector<8x8xf32> to vector<8x8xbf16>
    %62 = arith.truncf %59 : vector<8x8xf32> to vector<8x8xbf16>
    %cst_22 = arith.constant dense<0.000000e+00> : vector<8x8xf32>
    %63 = tpu.matmul %61, %62, %cst_22 {dimension_numbers = #tpu.dot_dimension_numbers<[1], [1], [0], [0], [0, 0, 1, 0], [], []>} : vector<8x8xbf16>, vector<8x8xbf16>, vector<8x8xf32> -> vector<8x8xf32>
    %cst_23 = arith.constant 0.353553385 : f32
    %64 = vector.broadcast %cst_23 : f32 to vector<8x8xf32>
    %65 = arith.mulf %63, %64 : vector<8x8xf32>
    %cst_24 = arith.constant dense<0xFF800000> : vector<8xf32>
    %66 = vector.multi_reduction <maximumf>, %65, %cst_24 [1] : vector<8x8xf32> to vector<8xf32>
    %67 = vector.shape_cast %66 : vector<8xf32> to vector<8x1xf32>
    %68 = vector.broadcast %67 : vector<8x1xf32> to vector<8x8xf32>
    %69 = arith.subf %65, %68 : vector<8x8xf32>
    %70 = math.exp %69 : vector<8x8xf32>
    %cst_25 = arith.constant dense<0.000000e+00> : vector<8xf32>
    %71 = vector.multi_reduction <add>, %70, %cst_25 [1] : vector<8x8xf32> to vector<8xf32>
    %72 = vector.shape_cast %71 : vector<8xf32> to vector<8x1xf32>
    %73 = tpu.reciprocal %72 {approx = true} : vector<8x1xf32> -> vector<8x1xf32>
    %74 = vector.broadcast %73 : vector<8x1xf32> to vector<8x8xf32>
    %75 = arith.mulf %70, %74 : vector<8x8xf32>
    %76 = arith.truncf %75 : vector<8x8xf32> to vector<8x8xbf16>
    %77 = arith.truncf %60 : vector<8x8xf32> to vector<8x8xbf16>
    %cst_26 = arith.constant dense<0.000000e+00> : vector<8x8xf32>
    %78 = tpu.matmul %76, %77, %cst_26 {dimension_numbers = #tpu.dot_dimension_numbers<[1], [0], [0], [1], [0, 0, 1, 1], [], []>} : vector<8x8xbf16>, vector<8x8xbf16>, vector<8x8xf32> -> vector<8x8xf32>
    %c0_27 = arith.constant 0 : index
    %c8 = arith.constant 8 : index
    %79 = vector.load %arg15[%c0_27, %c8] : memref<8x32xf32, #tpu.memory_space<vmem>>, vector<8x8xf32>
    tpu.vector_store %arg15[%c0_27, %c8], %78 {strides = array<i32>} : memref<8x32xf32, #tpu.memory_space<vmem>>, vector<8x8xf32>,
    %80 = vector.extract_strided_slice %35 {offsets = [0, 16], sizes = [8, 8], strides = [1, 1]} : vector<8x96xf32> to vector<8x8xf32>
    %81 = vector.extract_strided_slice %35 {offsets = [0, 48], sizes = [8, 8], strides = [1, 1]} : vector<8x96xf32> to vector<8x8xf32>
    %82 = vector.extract_strided_slice %35 {offsets = [0, 80], sizes = [8, 8], strides = [1, 1]} : vector<8x96xf32> to vector<8x8xf32>
    %83 = arith.truncf %80 : vector<8x8xf32> to vector<8x8xbf16>
    %84 = arith.truncf %81 : vector<8x8xf32> to vector<8x8xbf16>
    %cst_28 = arith.constant dense<0.000000e+00> : vector<8x8xf32>
    %85 = tpu.matmul %83, %84, %cst_28 {dimension_numbers = #tpu.dot_dimension_numbers<[1], [1], [0], [0], [0, 0, 1, 0], [], []>} : vector<8x8xbf16>, vector<8x8xbf16>, vector<8x8xf32> -> vector<8x8xf32>
    %cst_29 = arith.constant 0.353553385 : f32
    %86 = vector.broadcast %cst_29 : f32 to vector<8x8xf32>
    %87 = arith.mulf %85, %86 : vector<8x8xf32>
    %cst_30 = arith.constant dense<0xFF800000> : vector<8xf32>
    %88 = vector.multi_reduction <maximumf>, %87, %cst_30 [1] : vector<8x8xf32> to vector<8xf32>
    %89 = vector.shape_cast %88 : vector<8xf32> to vector<8x1xf32>
    %90 = vector.broadcast %89 : vector<8x1xf32> to vector<8x8xf32>
    %91 = arith.subf %87, %90 : vector<8x8xf32>
    %92 = math.exp %91 : vector<8x8xf32>
    %cst_31 = arith.constant dense<0.000000e+00> : vector<8xf32>
    %93 = vector.multi_reduction <add>, %92, %cst_31 [1] : vector<8x8xf32> to vector<8xf32>
    %94 = vector.shape_cast %93 : vector<8xf32> to vector<8x1xf32>
    %95 = tpu.reciprocal %94 {approx = true} : vector<8x1xf32> -> vector<8x1xf32>
    %96 = vector.broadcast %95 : vector<8x1xf32> to vector<8x8xf32>
    %97 = arith.mulf %92, %96 : vector<8x8xf32>
    %98 = arith.truncf %97 : vector<8x8xf32> to vector<8x8xbf16>
    %99 = arith.truncf %82 : vector<8x8xf32> to vector<8x8xbf16>
    %cst_32 = arith.constant dense<0.000000e+00> : vector<8x8xf32>
    %100 = tpu.matmul %98, %99, %cst_32 {dimension_numbers = #tpu.dot_dimension_numbers<[1], [0], [0], [1], [0, 0, 1, 1], [], []>} : vector<8x8xbf16>, vector<8x8xbf16>, vector<8x8xf32> -> vector<8x8xf32>
    %c0_33 = arith.constant 0 : index
    %c16 = arith.constant 16 : index
    %101 = vector.load %arg15[%c0_33, %c16] : memref<8x32xf32, #tpu.memory_space<vmem>>, vector<8x8xf32>
    tpu.vector_store %arg15[%c0_33, %c16], %100 {strides = array<i32>} : memref<8x32xf32, #tpu.memory_space<vmem>>, vector<8x8xf32>,
    %102 = vector.extract_strided_slice %35 {offsets = [0, 24], sizes = [8, 8], strides = [1, 1]} : vector<8x96xf32> to vector<8x8xf32>
    %103 = vector.extract_strided_slice %35 {offsets = [0, 56], sizes = [8, 8], strides = [1, 1]} : vector<8x96xf32> to vector<8x8xf32>
    %104 = vector.extract_strided_slice %35 {offsets = [0, 88], sizes = [8, 8], strides = [1, 1]} : vector<8x96xf32> to vector<8x8xf32>
    %105 = arith.truncf %102 : vector<8x8xf32> to vector<8x8xbf16>
    %106 = arith.truncf %103 : vector<8x8xf32> to vector<8x8xbf16>
    %cst_34 = arith.constant dense<0.000000e+00> : vector<8x8xf32>
    %107 = tpu.matmul %105, %106, %cst_34 {dimension_numbers = #tpu.dot_dimension_numbers<[1], [1], [0], [0], [0, 0, 1, 0], [], []>} : vector<8x8xbf16>, vector<8x8xbf16>, vector<8x8xf32> -> vector<8x8xf32>
    %cst_35 = arith.constant 0.353553385 : f32
    %108 = vector.broadcast %cst_35 : f32 to vector<8x8xf32>
    %109 = arith.mulf %107, %108 : vector<8x8xf32>
    %cst_36 = arith.constant dense<0xFF800000> : vector<8xf32>
    %110 = vector.multi_reduction <maximumf>, %109, %cst_36 [1] : vector<8x8xf32> to vector<8xf32>
    %111 = vector.shape_cast %110 : vector<8xf32> to vector<8x1xf32>
    %112 = vector.broadcast %111 : vector<8x1xf32> to vector<8x8xf32>
    %113 = arith.subf %109, %112 : vector<8x8xf32>
    %114 = math.exp %113 : vector<8x8xf32>
    %cst_37 = arith.constant dense<0.000000e+00> : vector<8xf32>
    %115 = vector.multi_reduction <add>, %114, %cst_37 [1] : vector<8x8xf32> to vector<8xf32>
    %116 = vector.shape_cast %115 : vector<8xf32> to vector<8x1xf32>
    %117 = tpu.reciprocal %116 {approx = true} : vector<8x1xf32> -> vector<8x1xf32>
    %118 = vector.broadcast %117 : vector<8x1xf32> to vector<8x8xf32>
    %119 = arith.mulf %114, %118 : vector<8x8xf32>
    %120 = arith.truncf %119 : vector<8x8xf32> to vector<8x8xbf16>
    %121 = arith.truncf %104 : vector<8x8xf32> to vector<8x8xbf16>
    %cst_38 = arith.constant dense<0.000000e+00> : vector<8x8xf32>
    %122 = tpu.matmul %120, %121, %cst_38 {dimension_numbers = #tpu.dot_dimension_numbers<[1], [0], [0], [1], [0, 0, 1, 1], [], []>} : vector<8x8xbf16>, vector<8x8xbf16>, vector<8x8xf32> -> vector<8x8xf32>
    %c0_39 = arith.constant 0 : index
    %c24 = arith.constant 24 : index
    %123 = vector.load %arg15[%c0_39, %c24] : memref<8x32xf32, #tpu.memory_space<vmem>>, vector<8x8xf32>
    tpu.vector_store %arg15[%c0_39, %c24], %122 {strides = array<i32>} : memref<8x32xf32, #tpu.memory_space<vmem>>, vector<8x8xf32>,
    %c0_40 = arith.constant 0 : index
    %c0_41 = arith.constant 0 : index
    %124 = vector.load %arg15[%c0_40, %c0_41] : memref<8x32xf32, #tpu.memory_space<vmem>>, vector<8x32xf32>
    %c0_42 = arith.constant 0 : index
    %c0_43 = arith.constant 0 : index
    %125 = vector.load %arg6[%c0_42, %c0_43] : memref<32x32xbf16, #tpu.memory_space<vmem>>, vector<32x32xbf16>
    %126 = arith.truncf %124 : vector<8x32xf32> to vector<8x32xbf16>
    %cst_44 = arith.constant dense<0.000000e+00> : vector<8x32xf32>
    %127 = tpu.matmul %126, %125, %cst_44 {dimension_numbers = #tpu.dot_dimension_numbers<[1], [0], [0], [1], [0, 0, 1, 1], [], []>} : vector<8x32xbf16>, vector<32x32xbf16>, vector<8x32xf32> -> vector<8x32xf32>
    %128 = arith.addf %1, %127 : vector<8x32xf32>
    %c0_45 = arith.constant 0 : index
    %c0_46 = arith.constant 0 : index
    %129 = vector.load %arg7[%c0_45, %c0_46] : memref<1x32xf32, #tpu.memory_space<vmem>>, vector<1x32xf32>
    %130 = vector.shape_cast %129 : vector<1x32xf32> to vector<32xf32>
    %131 = vector.shape_cast %130 : vector<32xf32> to vector<1x32xf32>
    %132 = vector.broadcast %131 : vector<1x32xf32> to vector<8x32xf32>
    %133 = arith.addf %128, %132 : vector<8x32xf32>
    %c0_47 = arith.constant 0 : index
    %c0_48 = arith.constant 0 : index
    %134 = vector.load %arg8[%c0_47, %c0_48] : memref<1x32xf32, #tpu.memory_space<vmem>>, vector<1x32xf32>
    %135 = vector.shape_cast %134 : vector<1x32xf32> to vector<32xf32>
    %c0_49 = arith.constant 0 : index
    %c0_50 = arith.constant 0 : index
    %136 = vector.load %arg9[%c0_49, %c0_50] : memref<1x32xf32, #tpu.memory_space<vmem>>, vector<1x32xf32>
    %137 = vector.shape_cast %136 : vector<1x32xf32> to vector<32xf32>
    %cst_51 = arith.constant dense<0.000000e+00> : vector<8xf32>
    %138 = vector.multi_reduction <add>, %133, %cst_51 [1] : vector<8x32xf32> to vector<8xf32>
    %139 = vector.shape_cast %138 : vector<8xf32> to vector<8x1xf32>
    %cst_52 = arith.constant 3.200000e+01 : f32
    %140 = vector.broadcast %cst_52 : f32 to vector<8x1xf32>
    %141 = arith.divf %139, %140 : vector<8x1xf32>
    %142 = vector.broadcast %141 : vector<8x1xf32> to vector<8x32xf32>
    %143 = arith.subf %133, %142 : vector<8x32xf32>
    %144 = arith.mulf %143, %143 : vector<8x32xf32>
    %cst_53 = arith.constant dense<0.000000e+00> : vector<8xf32>
    %145 = vector.multi_reduction <add>, %144, %cst_53 [1] : vector<8x32xf32> to vector<8xf32>
    %146 = vector.shape_cast %145 : vector<8xf32> to vector<8x1xf32>
    %cst_54 = arith.constant 3.200000e+01 : f32
    %147 = vector.broadcast %cst_54 : f32 to vector<8x1xf32>
    %148 = arith.divf %146, %147 : vector<8x1xf32>
    %cst_55 = arith.constant 9.99999996E-13 : f32
    %149 = vector.broadcast %cst_55 : f32 to vector<8x1xf32>
    %150 = arith.addf %148, %149 : vector<8x1xf32>
    %151 = math.rsqrt %150 : vector<8x1xf32>
    %152 = vector.broadcast %151 : vector<8x1xf32> to vector<8x32xf32>
    %153 = arith.mulf %143, %152 : vector<8x32xf32>
    %154 = vector.shape_cast %135 : vector<32xf32> to vector<1x32xf32>
    %155 = vector.broadcast %154 : vector<1x32xf32> to vector<8x32xf32>
    %156 = arith.mulf %155, %153 : vector<8x32xf32>
    %157 = vector.shape_cast %137 : vector<32xf32> to vector<1x32xf32>
    %158 = vector.broadcast %157 : vector<1x32xf32> to vector<8x32xf32>
    %159 = arith.addf %156, %158 : vector<8x32xf32>
    %c0_56 = arith.constant 0 : index
    %c0_57 = arith.constant 0 : index
    %160 = vector.load %arg10[%c0_56, %c0_57] : memref<32x128xbf16, #tpu.memory_space<vmem>>, vector<32x128xbf16>
    %161 = arith.truncf %159 : vector<8x32xf32> to vector<8x32xbf16>
    %cst_58 = arith.constant dense<0.000000e+00> : vector<8x128xf32>
    %162 = tpu.matmul %161, %160, %cst_58 {dimension_numbers = #tpu.dot_dimension_numbers<[1], [0], [0], [1], [0, 0, 1, 1], [], []>} : vector<8x32xbf16>, vector<32x128xbf16>, vector<8x128xf32> -> vector<8x128xf32>
    %c0_59 = arith.constant 0 : index
    %c0_60 = arith.constant 0 : index
    %163 = vector.load %arg11[%c0_59, %c0_60] : memref<1x128xf32, #tpu.memory_space<vmem>>, vector<1x128xf32>
    %164 = vector.shape_cast %163 : vector<1x128xf32> to vector<128xf32>
    %165 = vector.shape_cast %164 : vector<128xf32> to vector<1x128xf32>
    %166 = vector.broadcast %165 : vector<1x128xf32> to vector<8x128xf32>
    %167 = arith.addf %162, %166 : vector<8x128xf32>
    %cst_61 = arith.constant 1.702000e+00 : f32
    %168 = vector.broadcast %cst_61 : f32 to vector<8x128xf32>
    %169 = arith.mulf %168, %167 : vector<8x128xf32>
    %170 = arith.negf %169 : vector<8x128xf32>
    %171 = math.exp %170 : vector<8x128xf32>
    %cst_62 = arith.constant 1.000000e+00 : f32
    %172 = vector.broadcast %cst_62 : f32 to vector<8x128xf32>
    %173 = arith.addf %172, %171 : vector<8x128xf32>
    %174 = arith.divf %172, %173 : vector<8x128xf32>
    %175 = arith.mulf %167, %174 : vector<8x128xf32>
    %c0_63 = arith.constant 0 : index
    %c0_64 = arith.constant 0 : index
    %176 = vector.load %arg12[%c0_63, %c0_64] : memref<128x32xbf16, #tpu.memory_space<vmem>>, vector<128x32xbf16>
    %177 = arith.truncf %175 : vector<8x128xf32> to vector<8x128xbf16>
    %cst_65 = arith.constant dense<0.000000e+00> : vector<8x32xf32>
    %178 = tpu.matmul %177, %176, %cst_65 {dimension_numbers = #tpu.dot_dimension_numbers<[1], [0], [0], [1], [0, 0, 1, 1], [], []>} : vector<8x128xbf16>, vector<128x32xbf16>, vector<8x32xf32> -> vector<8x32xf32>
    %179 = arith.addf %133, %178 : vector<8x32xf32>
    %c0_66 = arith.constant 0 : index
    %c0_67 = arith.constant 0 : index
    %180 = vector.load %arg13[%c0_66, %c0_67] : memref<1x32xf32, #tpu.memory_space<vmem>>, vector<1x32xf32>
    %181 = vector.shape_cast %180 : vector<1x32xf32> to vector<32xf32>
    %182 = vector.shape_cast %181 : vector<32xf32> to vector<1x32xf32>
    %183 = vector.broadcast %182 : vector<1x32xf32> to vector<8x32xf32>
    %184 = arith.addf %179, %183 : vector<8x32xf32>
    %c0_68 = arith.constant 0 : index
    %c0_69 = arith.constant 0 : index
    %c0_70 = arith.constant 0 : index
    %185 = vector.load %arg14[%c0_68, %c0_69, %c0_70] : memref<1x8x32xf32, #tpu.memory_space<vmem>>, vector<1x8x32xf32>
    %186 = vector.shape_cast %185 : vector<1x8x32xf32> to vector<8x32xf32>
    %187 = vector.shape_cast %184 : vector<8x32xf32> to vector<1x8x32xf32>
    tpu.vector_store %arg14[%c0_68, %c0_69, %c0_70], %187 {strides = array<i32>} : memref<1x8x32xf32, #tpu.memory_space<vmem>>, vector<1x8x32xf32>,
    return
  }
  func.func @transform_0(%arg0: i32) -> (i32, i32, i32) {
    %c0_i32 = arith.constant 0 : i32
    %c0_i32_0 = arith.constant 0 : i32
    %c0_i32_1 = arith.constant 0 : i32
    return %arg0, %c0_i32, %c0_i32_0 : i32, i32, i32
  }
  func.func @transform_1(%arg0: i32) -> (i32, i32) {
    %c0_i32 = arith.constant 0 : i32
    %c0_i32_0 = arith.constant 0 : i32
    %c0_i32_1 = arith.constant 0 : i32
    return %c0_i32, %c0_i32_0 : i32, i32
  }
  func.func @transform_2(%arg0: i32) -> (i32, i32) {
    %c0_i32 = arith.constant 0 : i32
    %c0_i32_0 = arith.constant 0 : i32
    %c0_i32_1 = arith.constant 0 : i32
    return %c0_i32, %c0_i32_0 : i32, i32
  }
  func.func @transform_3(%arg0: i32) -> (i32, i32) {
    %c0_i32 = arith.constant 0 : i32
    %c0_i32_0 = arith.constant 0 : i32
    %c0_i32_1 = arith.constant 0 : i32
    return %c0_i32, %c0_i32_0 : i32, i32
  }
  func.func @transform_4(%arg0: i32) -> (i32, i32) {
    %c0_i32 = arith.constant 0 : i32
    %c0_i32_0 = arith.constant 0 : i32
    %c0_i32_1 = arith.constant 0 : i32
    return %c0_i32, %c0_i32_0 : i32, i32
  }
  func.func @transform_5(%arg0: i32) -> (i32, i32) {
    %c0_i32 = arith.constant 0 : i32
    %c0_i32_0 = arith.constant 0 : i32
    %c0_i32_1 = arith.constant 0 : i32
    return %c0_i32, %c0_i32_0 : i32, i32
  }
  func.func @transform_6(%arg0: i32) -> (i32, i32) {
    %c0_i32 = arith.constant 0 : i32
    %c0_i32_0 = arith.constant 0 : i32
    %c0_i32_1 = arith.constant 0 : i32
    return %c0_i32, %c0_i32_0 : i32, i32
  }
  func.func @transform_7(%arg0: i32) -> (i32, i32) {
    %c0_i32 = arith.constant 0 : i32
    %c0_i32_0 = arith.constant 0 : i32
    %c0_i32_1 = arith.constant 0 : i32
    return %c0_i32, %c0_i32_0 : i32, i32
  }
  func.func @transform_8(%arg0: i32) -> (i32, i32) {
    %c0_i32 = arith.constant 0 : i32
    %c0_i32_0 = arith.constant 0 : i32
    %c0_i32_1 = arith.constant 0 : i32
    return %c0_i32, %c0_i32_0 : i32, i32
  }
  func.func @transform_9(%arg0: i32) -> (i32, i32) {
    %c0_i32 = arith.constant 0 : i32
    %c0_i32_0 = arith.constant 0 : i32
    %c0_i32_1 = arith.constant 0 : i32
    return %c0_i32, %c0_i32_0 : i32, i32
  }
  func.func @transform_10(%arg0: i32) -> (i32, i32) {
    %c0_i32 = arith.constant 0 : i32
    %c0_i32_0 = arith.constant 0 : i32
    %c0_i32_1 = arith.constant 0 : i32
    return %c0_i32, %c0_i32_0 : i32, i32
  }
  func.func @transform_11(%arg0: i32) -> (i32, i32) {
    %c0_i32 = arith.constant 0 : i32
    %c0_i32_0 = arith.constant 0 : i32
    %c0_i32_1 = arith.constant 0 : i32
    return %c0_i32, %c0_i32_0 : i32, i32
  }
  func.func @transform_12(%arg0: i32) -> (i32, i32) {
    %c0_i32 = arith.constant 0 : i32
    %c0_i32_0 = arith.constant 0 : i32
    %c0_i32_1 = arith.constant 0 : i32
    return %c0_i32, %c0_i32_0 : i32, i32
  }
  func.func @transform_13(%arg0: i32) -> (i32, i32, i32) {
    %c0_i32 = arith.constant 0 : i32
    %c0_i32_0 = arith.constant 0 : i32
    %c0_i32_1 = arith.constant 0 : i32
    return %arg0, %c0_i32, %c0_i32_0 : i32, i32, i32
  }
}

</mosaic_0001>

<bundles_post_ra>
// kernel: tpu_custom_call.1
= control target key start
LH: loop header
LB: loop body
LE: loop exit
PB: predicated region body
PF: predicated region fallthrough
CT: control target
= control target key end

     0   :  { %s2046_s0 = inlined_call_operand.vmem [shape: f32[2,8,32], index: 0, kind: input, shape index: {}]   ;;  %s2047_s1 = inlined_call_operand.vmem [shape: f32[1,32], index: 1, kind: input, shape index: {}]   ;;  %s2048_s2 = inlined_call_operand.vmem [shape: f32[1,32], index: 2, kind: input, shape index: {}]   ;;  %s2049_s3 = inlined_call_operand.vmem [shape: bf16[32,96], index: 3, kind: input, shape index: {}]   ;;  %s2050_s4 = inlined_call_operand.vmem [shape: f32[1,96], index: 4, kind: input, shape index: {}]   ;;  %s2051_s5 = inlined_call_operand.vmem [shape: bf16[32,32], index: 5, kind: input, shape index: {}]   ;;  %s2052_s6 = inlined_call_operand.vmem [shape: f32[1,32], index: 6, kind: input, shape index: {}]   ;;  %s2053_s7 = inlined_call_operand.vmem [shape: f32[1,32], index: 7, kind: input, shape index: {}]   ;;  %s2054_s8 = inlined_call_operand.vmem [shape: f32[1,32], index: 8, kind: input, shape index: {}]   ;;  %s2055_s9 = inlined_call_operand.vmem [shape: bf16[32,128], index: 9, kind: input, shape index: {}]   ;;  %s2056_s10 = inlined_call_operand.vmem [shape: f32[1,128], index: 10, kind: input, shape index: {}]   ;;  %s2057_s11 = inlined_call_operand.vmem [shape: bf16[128,32], index: 11, kind: input, shape index: {}]   ;;  %s2058_s12 = inlined_call_operand.vmem [shape: f32[1,32], index: 12, kind: input, shape index: {}]   ;;  %s2059_s13 = inlined_call_operand.hbm [shape: f32[2,8,32], index: 13, kind: output, shape index: {}]  }
   0x1   :  { %2060 = sst [smem:[#allocation6_spill]] %s2046_s0 }
   0x2   :  { %2061 = sst [smem:[#allocation7_spill]] %s2047_s1 }
   0x3   :  { %2062 = sst [smem:[#allocation8_spill]] %s2048_s2 }
   0x4   :  { %18 = vsyncpa [#allocation4], 0 }
   0x5   :  { %20 = vsyncpa [#allocation4 + $0x1], 0  ;;  %s1777_s25 = smov 0   ;;  %s1779_s26 = smov 0  }
   0x6   :  { %s1781_s27 = smov 0   ;;  %s1783_s28 = smov 0  }
   0x7 LB: > { %s1798_s29 = sadd.s32 4294967295, %s1688_s28   ;;  %s1363_s30 = sadd.s32 4294967294, %s1688_s28   ;;  %s1688_s28 = sphi %s1783_s28, %s2071_s28   ;;  %s1684_s27 = sphi %s1781_s27, %s2070_s27   ;;  %s1680_s26 = sphi %s1779_s26, %s2069_s26   ;;  %s1676_s25 = sphi %s1777_s25, %s2068_s25  }
   0x8   : > { %s1802_s14 = sadd.s32 1, %s1688_s28   ;;  %s311_s15 = sadd.s32 1, %s1684_s27 }
   0x9   : > { %s308_s16 = ssub.s32 %s1688_s28, %s1802_s14  ;;  %p321_p0 = scmp.ne.s32.totalorder %s1684_s27, %s1680_s26 }
   0xa   : > { %p309_p1 = scmp.eq.s32.totalorder %s308_s16, 0  ;;  %p322_p2 = scmp.eq.s32.totalorder %s1798_s29, 1 }
   0xb   : > { %p327_p3 = scmp.ne.s32.totalorder %s1680_s26, %s1676_s25  ;;  %p328_p4 = scmp.eq.s32.totalorder %s1363_s30, 1 }
   0xc   : > { %s1813_s17 = scalar_select %p309_p1, %s1684_s27, %s311_s15  }
   0xd   : > { %p1815_p5 = por %p322_p2, %p321_p0  ;;  %p1819_p6 = por %p328_p4, %p327_p3 }
   0xe   : > { %p1366_p7 = scmp.ge.s32.totalorder %s1688_s28, 1  ;;  %p389_p8 = scmp.lt.s32.totalorder %s1688_s28, 3 }
  0x10   : > { %p390_p9 = pnand %p1366_p7, %p389_p8 }
  0x11   : > { %p432_p10 = scmp.lt.s32.totalorder (!%p390_p9), %s1798_s29, 1  ;;  %vm440_vm0 = vcmask (!%p390_p9), 261120   ;;  %s2065_s0 = sld [smem:[#allocation6_spill]] (!%p390_p9)  ;;  %v1588_v7 = vld [vmem:[%s2049_s3] sm:$0xff] (!%p390_p9)   ;;  %v1690_v8 = vmov (!%p390_p9), 0.0   ;;  %vm1691_vm1 = vmmov (!%p390_p9), 0  }
  0x12   : > { %393 = sbr.rel (%p390_p9) target bundleno = 2619 (0xa3b), region = 72  ;;  %1441 = vmatprep.subr.bf16.mxu0 (!%p390_p9), %v1690_v8  ;;  %1445 = vmatprep.mubr.msk.bf16.mxu0 (!%p390_p9), %vm1691_vm1, %v1690_v8  ;;  %v1589_v9 = vld [vmem:[%s2049_s3 + $0x8] sm:$0xff] (!%p390_p9)   ;;  %s2066_s1 = sld [smem:[#allocation7_spill]] (!%p390_p9)  ;;  %v1371_v20 = vld [vmem:[%s2050_s4] ss:$0 sm:$0xff] (!%p390_p9)  ;;  %vm540_vm2 = vcmask (!%p390_p9), 64512  }
  0x13   : > { %1442 = vmatpush3.bf16.msra.mxu0 (!%p390_p9), %v1588_v7  ;;  %1461 = vmatprep.subr.bf16.mxu1 (!%p390_p9), %v1690_v8  ;;  %s2067_s2 = sld [smem:[#allocation8_spill]] (!%p390_p9)  ;;  %s1692_s16 = smov (!%p390_p9), 120   ;;  %vm605_vm3 = vcmask (!%p390_p9), 1043456   ;;  %vm765_vm4 = vcmask (!%p390_p9), 130112   ;;  %vm882_vm5 = vcmask (!%p390_p9), 195712   ;;  %vm999_vm6 = vcmask (!%p390_p9), 261312  }
  0x14   : > { %1443 = vmatprep.subr.bf16.mxu0 (!%p390_p9), %v1690_v8  ;;  %1463 = vmatprep.mubr.msk.bf16.mxu1 (!%p390_p9), %vm1691_vm1, %v1690_v8  ;;  %s1695_s22 = smov (!%p390_p9), 80   ;;  %s1696_s23 = smov (!%p390_p9), 112  }
  0x15   : > { %s1698_s30 = smov (!%p390_p9), 104   ;;  %s1699_s15 = smov (!%p390_p9), 64  }
  0x17   : > { %1444 = vmatpush3.bf16.msra.mxu0 (!%p390_p9), %v1589_v9 }
  0x18   : > { %1449 = vmatprep.subr.bf16.mxu0 (!%p390_p9), %v1690_v8  ;;  %v1369_v14 = vld [vmem:[%s2066_s1] ss:$0 sm:$0xff] (!%p390_p9) }
  0x19   : > { %s433_s20 = scalar_select %p432_p10, %s1798_s29, 1  ;;  %v1370_v16 = vld [vmem:[%s2067_s2] ss:$0 sm:$0xff] }
  0x1b   : > { %s1368_s21 = sshll.u32 %s433_s20, 3  ;;  %s1693_s20 = smov 96  }
  0x1c   : > { %s435_s24 = scalar_lea.vmem %s2065_s0, %s1368_s21  ;;  %s1694_s21 = smov 88  }
  0x1d   : > { %v1830_v0 = vld [vmem:[%s435_s24] sm:$0xff]  ;;  %s1697_s24 = smov 72  }
  0x1e   : > { %v441_v1 = vsel %vm440_vm0, %v1830_v0, 0.0 }
  0x1f   : > { %442 = vadd.xlane.f32.xlu0 %v441_v1 }
  0xac   : > { %v443_v2 = vpop.xlane.xlu0 %442 }
  0xad   : > { %v445_v3 = vmul.f32 0.03125, %v443_v2 }
  0xaf   : > { %v446_v4 = vsub.f32 %v1830_v0, %v445_v3 }
  0xb1   : > { %v447_v5 = vmul.f32 %v446_v4, %v446_v4 }
  0xb3   : > { %v448_v6 = vsel %vm440_vm0, %v447_v5, 0.0 }
  0xb4   : > { %449 = vadd.xlane.f32.xlu0 %v448_v6 }
 0x141   : > { %v450_v10 = vpop.xlane.xlu0 %449 }
 0x142   : > { %v451_v11 = vmul.f32 0.03125, %v450_v10 }
 0x144   : > { %v452_v12 = vadd.f32 1e-12, %v451_v11 }
 0x146   : > { %1602 = vrsqrt.f32 %v452_v12 }
 0x150   : > { %v1603_v13 = vpop.eup %1602 }
 0x151   : > { %v454_v15 = vmul.f32 %v1603_v13, %v446_v4 }
 0x153   : > { %v461_v17 = vmul.f32 %v1369_v14, %v454_v15 }
 0x155   : > { %v468_v18 = vadd.f32 %v1370_v16, %v461_v17 }
 0x157   : > { %v473_v19 = vpack.c.bf16 %v468_v18, %v468_v18 }
 0x159   : > { %1446 = vmatmul.mubr.msk.bf16.vlgmr.msra.gmra.mrb[0].mxu0 %vm440_vm0, %v473_v19 }
 0x15a   : > { %1451 = vmatprep.mubr.msk.bf16.mxu0 %vm1691_vm1, %v1690_v8 }
 0x22c   : > { %v530_v21 = vpop.f32.mrb[0].mxu0 }
 0x22d   : > { %v531_v22 = vadd.f32 %v1371_v20, %v530_v21  ;;  %v1447_v23 = vpop.f32.mrb[1].mxu0 }
 0x22e   : > { %v533_v24 = vpop.f32.mrb[2].mxu0 }
 0x22f   : > { %v1862_v25 = vpack.c.bf16 %v531_v22, %v531_v22  ;;  %v1448_v26 = vpop.f32.mrb[3].mxu0 }
 0x231   : > { %650 = vrot.lane.b32.xlu0 %v1862_v25, %s1692_s16  ;;  %538 = vrot.lane.b32.xlu1 %v1862_v25, %s1693_s20  ;;  %s1700_s16 = smov 56   ;;  %s1701_s20 = smov 48  }
 0x235   : > { %652 = vrot.lane.b32.xlu1 %v1862_v25, %s1694_s21  ;;  %s1702_s21 = smov 40  }
 0x239   : > { %769 = vrot.lane.b32.xlu1 %v1862_v25, %s1695_s22  ;;  %s1703_s22 = smov 8  }
 0x23d   : > { %767 = vrot.lane.b32.xlu1 %v1862_v25, %s1696_s23 }
 0x241   : > { %886 = vrot.lane.b32.xlu1 %v1862_v25, %s1697_s24 }
 0x245   : > { %884 = vrot.lane.b32.xlu1 %v1862_v25, %s1698_s30  ;;  %s429_s30 = sand.u32 1, %s1680_s26  }
 0x2a3   : > { %v539_v27 = vpop.permute.xlu1 %538  ;;  %v651_v32 = vpop.permute.xlu0 %650 }
 0x2a4   : > { %v545_v28 = vsel %vm540_vm2, %v539_v27, 0 }
 0x2a5   : > { %1450 = vmatpush3.bf16.xpose.msra.mxu0 %v545_v28 }
 0x2a6   : > { %1455 = vmatprep.subr.bf16.mxu0 %v1690_v8 }
 0x2a7   : > { %v653_v29 = vpop.permute.xlu1 %652 }
 0x2a8   : > { %v658_v30 = vsel %vm540_vm2, %v653_v29, 0 }
 0x2a9   : > { %1462 = vmatpush3.bf16.xpose.msra.mxu1 %v658_v30 }
 0x2aa   : > { %1473 = vmatprep.subr.bf16.mxu1 %v1690_v8 }
 0x2ab   : > { %v770_v31 = vpop.permute.xlu1 %769 }
 0x2ac   : > { %1452 = vmatmul.mubr.msk.bf16.vlgmr.msra.gmra.mrb[4].mxu0 %vm540_vm2, %v1862_v25  ;;  %v775_v34 = vsel %vm540_vm2, %v770_v31, 0 }
 0x2ad   : > { %1457 = vmatprep.mubr.msk.bf16.mxu0 %vm1691_vm1, %v1690_v8 }
 0x2af   : > { %v768_v33 = vpop.permute.xlu1 %767 }
 0x2b0   : > { %1464 = vmatmul.mubr.msk.bf16.vlgmr.msra.gmra.mrb[0].mxu1 %vm540_vm2, %v651_v32 }
 0x2b1   : > { %1474 = vmatpush3.bf16.xpose.msra.mxu1 %v775_v34  ;;  %1475 = vmatprep.mubr.msk.bf16.mxu1 %vm1691_vm1, %v1690_v8 }
 0x2b2   : > { %1485 = vmatprep.subr.bf16.mxu1 %v1690_v8 }
 0x2b3   : > { %v887_v35 = vpop.permute.xlu1 %886 }
 0x2b4   : > { %v892_v36 = vsel %vm540_vm2, %v887_v35, 0 }
 0x2b7   : > { %v885_v37 = vpop.permute.xlu1 %884 }
 0x2b8   : > { %1476 = vmatmul.mubr.msk.bf16.vlgmr.msra.gmra.mrb[4].mxu1 %vm540_vm2, %v768_v33 }
 0x2b9   : > { %1486 = vmatpush3.bf16.xpose.msra.mxu1 %v892_v36  ;;  %1487 = vmatprep.mubr.msk.bf16.mxu1 %vm1691_vm1, %v1690_v8 }
 0x2ba   : > { %1497 = vmatprep.subr.bf16.mxu1 %v1690_v8 }
 0x2c0   : > { %1488 = vmatmul.mubr.msk.bf16.vlgmr.msra.gmra.mrb[8].mxu1 %vm540_vm2, %v885_v37 }
 0x2c1   : > { %1501 = vmatprep.mubr.msk.bf16.mxu1 %vm1691_vm1, %v1690_v8 }
 0x37f   : > { %v581_v38 = vpop.f32.mrb[4].mxu0 }
 0x380   : > { %v587_v39 = vmul.f32 0.35355338, %v581_v38  ;;  %v1453_v40 = vpop.f32.mrb[5].mxu0 }
 0x381   : > { %v584_v41 = vpop.f32.mrb[6].mxu0 }
 0x382   : > { %v1454_v42 = vpop.f32.mrb[7].mxu0  ;;  %v588_v43 = vsel %vm540_vm2, %v587_v39, -inf }
 0x383   : > { %v694_v44 = vpop.f32.mrb[0].mxu1  ;;  %589 = vmax.xlane.f32.xlu1 %v588_v43 }
 0x384   : > { %v700_v45 = vmul.f32 0.35355338, %v694_v44  ;;  %v1465_v46 = vpop.f32.mrb[1].mxu1 }
 0x385   : > { %v697_v47 = vpop.f32.mrb[2].mxu1 }
 0x386   : > { %v1466_v48 = vpop.f32.mrb[3].mxu1  ;;  %v701_v49 = vsel %vm540_vm2, %v700_v45, -inf }
 0x387   : > { %702 = vmax.xlane.f32.xlu0 %v701_v49 }
 0x38b   : > { %v811_v50 = vpop.f32.mrb[4].mxu1 }
 0x38c   : > { %v817_v51 = vmul.f32 0.35355338, %v811_v50  ;;  %v1477_v52 = vpop.f32.mrb[5].mxu1 }
 0x38d   : > { %v814_v53 = vpop.f32.mrb[6].mxu1  ;;  %v1590_v52 = vld [vmem:[%s2051_s5] sm:$0xff]  }
 0x38e   : > { %v1478_v54 = vpop.f32.mrb[7].mxu1  ;;  %v818_v55 = vsel %vm540_vm2, %v817_v51, -inf  ;;  %1498 = vmatpush3.bf16.msra.mxu1 %v1590_v52  ;;  %v1591_v53 = vld [vmem:[%s2051_s5 + $0x8] sm:$0xff]  }
 0x38f   : > { %819 = vmax.xlane.f32.xlu1 %v818_v55  ;;  %1499 = vmatprep.subr.bf16.mxu1 %v1690_v8 }
 0x392   : > { %1500 = vmatpush3.bf16.msra.mxu1 %v1591_v53 }
 0x393   : > { %v928_v56 = vpop.f32.mrb[8].mxu1  ;;  %1513 = vmatprep.subr.bf16.mxu1 %v1690_v8 }
 0x394   : > { %v934_v57 = vmul.f32 0.35355338, %v928_v56  ;;  %v1489_v58 = vpop.f32.mrb[9].mxu1 }
 0x395   : > { %v931_v59 = vpop.f32.mrb[10].mxu1 }
 0x396   : > { %v1490_v60 = vpop.f32.mrb[11].mxu1  ;;  %v935_v61 = vsel %vm540_vm2, %v934_v57, -inf }
 0x397   : > { %936 = vmax.xlane.f32.xlu0 %v935_v61 }
 0x410   : > { %v590_v62 = vpop.xlane.xlu1 %589 }
 0x411   : > { %v591_v63 = vsub.f32 %v587_v39, %v590_v62 }
 0x413   : > { %v592_v1 = vmul.f32 1.442695, %v591_v63 }
 0x414   : > { %v703_v2 = vpop.xlane.xlu0 %702 }
 0x415   : > { %1604 = vpow2.f32 %v592_v1  ;;  %v704_v3 = vsub.f32 %v700_v45, %v703_v2 }
 0x417   : > { %v705_v4 = vmul.f32 1.442695, %v704_v3 }
 0x419   : > { %1606 = vpow2.f32 %v705_v4 }
 0x41c   : > { %v820_v15 = vpop.xlane.xlu1 %819 }
 0x41d   : > { %v821_v16 = vsub.f32 %v817_v51, %v820_v15 }
 0x41f   : > { %v1605_v5 = vpop.eup %1604  ;;  %v822_v17 = vmul.f32 1.442695, %v821_v16 }
 0x420   : > { %v594_v6 = vsel %vm540_vm2, %v1605_v5, 0.0 }
 0x421   : > { %595 = vadd.xlane.f32.xlu1 %v594_v6 }
 0x423   : > { %v1607_v7 = vpop.eup %1606 }
 0x424   : > { %v937_v9 = vpop.xlane.xlu0 %936  ;;  %v707_v10 = vsel %vm540_vm2, %v1607_v7, 0.0 }
 0x425   : > { %v938_v11 = vsub.f32 %v934_v57, %v937_v9  ;;  %708 = vadd.xlane.f32.xlu0 %v707_v10 }
 0x427   : > { %v939_v12 = vmul.f32 1.442695, %v938_v11 }
 0x429   : > { %1608 = vpow2.f32 %v939_v12 }
 0x42a   : > { %1610 = vpow2.f32 %v822_v17 }
 0x432   : > { %600 = vrot.lane.b32.xlu1 %v1862_v25, %s1699_s15  ;;  %s1367_s15 = sshll.u32 %s429_s30, 3 }
 0x433   : > { %v1609_v13 = vpop.eup %1608 }
 0x434   : > { %v941_v14 = vsel %vm540_vm2, %v1609_v13, 0.0  ;;  %v1611_v18 = vpop.eup %1610 }
 0x435   : > { %942 = vadd.xlane.f32.xlu0 %v941_v14  ;;  %v824_v19 = vsel %vm540_vm2, %v1611_v18, 0.0 }
 0x44b   : > { %713 = vrot.lane.b32.xlu0 %v1862_v25, %s1700_s16  ;;  %s1704_s16 = smov 16  }
 0x456   : > { %825 = vadd.xlane.f32.xlu1 %v824_v19 }
 0x467   : > { %830 = vrot.lane.b32.xlu1 %v1862_v25, %s1701_s20  ;;  %s1705_s20 = smov 24  }
 0x46b   : > { %947 = vrot.lane.b32.xlu1 %v1862_v25, %s1702_s21  ;;  %s1404_s21 = sshll.u32 %s1798_s29, 7  ;;  %s1291_s29 = scalar_lea.sflag [#allocation4], %s429_s30 }
 0x46c   : > { %s2003_s1 = scalar_lea.hbm %s2059_s13, %s1404_s21 }
 0x4ae   : > { %v596_v20 = vpop.xlane.xlu1 %595 }
 0x4af   : > { %1612 = vrcp.f32 %v596_v20 }
 0x4b2   : > { %v601_v21 = vpop.permute.xlu1 %600  ;;  %v709_v23 = vpop.xlane.xlu0 %708 }
 0x4b3   : > { %v607_v22 = vsel %vm605_vm3, %v601_v21, 0  ;;  %1614 = vrcp.f32 %v709_v23  ;;  %v1387_v23 = vld [vmem:[%s2053_s7] ss:$0 sm:$0xff] }
 0x4b4   : > { %1456 = vmatpush3.bf16.msra.mxu0 %v607_v22 }
 0x4b5   : > { %1467 = vmatprep.subr.bf16.mxu0 %v1690_v8 }
 0x4b9   : > { %v1613_v24 = vpop.eup %1612 }
 0x4ba   : > { %v598_v26 = vmul.f32 %v1613_v24, %v1605_v5  ;;  %v1386_v5 = vld [vmem:[%s2052_s6] ss:$0 sm:$0xff] }
 0x4bc   : > { %v599_v27 = vpack.c.bf16 %v598_v26, %v598_v26  ;;  %v1388_v26 = vld [vmem:[%s2054_s8] ss:$0 sm:$0xff] }
 0x4bd   : > { %v1615_v25 = vpop.eup %1614 }
 0x4be   : > { %1458 = vmatmul.mubr.msk.bf16.vlgmr.msra.gmra.mrb[8].mxu0 %vm540_vm2, %v599_v27  ;;  %v711_v29 = vmul.f32 %v1615_v25, %v1607_v7 }
 0x4bf   : > { %1469 = vmatprep.mubr.msk.bf16.mxu0 %vm1691_vm1, %v1690_v8 }
 0x4c0   : > { %v712_v32 = vpack.c.bf16 %v711_v29, %v711_v29  ;;  %v1594_v29 = vld [vmem:[%s2057_s11] sm:$0xff]  }
 0x4c2   : > { %v943_v28 = vpop.xlane.xlu0 %942 }
 0x4c6   : > { %v714_v30 = vpop.permute.xlu0 %713 }
 0x4c7   : > { %v719_v31 = vsel %vm605_vm3, %v714_v30, 0  ;;  %v1595_v30 = vld [vmem:[%s2057_s11 + $0x8] sm:$0xff]  }
 0x4c8   : > { %1468 = vmatpush3.bf16.msra.mxu0 %v719_v31  ;;  %v1596_v31 = vld [vmem:[%s2057_s11 + $0x10] sm:$0xff]  }
 0x4c9   : > { %1479 = vmatprep.subr.bf16.mxu0 %v1690_v8 }
 0x4cb   : > { %1470 = vmatmul.mubr.msk.bf16.vlgmr.msra.gmra.mrb[12].mxu0 %vm540_vm2, %v712_v32  ;;  %v1597_v32 = vld [vmem:[%s2057_s11 + $0x18] sm:$0xff]  }
 0x4cc   : > { %1481 = vmatprep.mubr.msk.bf16.mxu0 %vm1691_vm1, %v1690_v8 }
 0x4e3   : > { %v826_v33 = vpop.xlane.xlu1 %825 }
 0x4e4   : > { %1616 = vrcp.f32 %v826_v33  ;;  %v1598_v33 = vld [vmem:[%s2057_s11 + $0x20] sm:$0xff]  }
 0x4e5   : > { %1618 = vrcp.f32 %v943_v28 }
 0x4e7   : > { %v831_v34 = vpop.permute.xlu1 %830 }
 0x4e8   : > { %v836_v35 = vsel %vm605_vm3, %v831_v34, 0  ;;  %v1599_v34 = vld [vmem:[%s2057_s11 + $0x28] sm:$0xff]  }
 0x4e9   : > { %1480 = vmatpush3.bf16.msra.mxu0 %v836_v35  ;;  %v1600_v35 = vld [vmem:[%s2057_s11 + $0x30] sm:$0xff]  }
 0x4ea   : > { %1491 = vmatprep.subr.bf16.mxu0 %v1690_v8 }
 0x4eb   : > { %v948_v38 = vpop.permute.xlu1 %947 }
 0x4ec   : > { %v953_v41 = vsel %vm605_vm3, %v948_v38, 0 }
 0x4ee   : > { %v1617_v36 = vpop.eup %1616 }
 0x4ef   : > { %v828_v37 = vmul.f32 %v1617_v36, %v1611_v18  ;;  %v1619_v40 = vpop.eup %1618  ;;  %v1593_v18 = vld [vmem:[%s2055_s9 + $0x8] sm:$0xff]   ;;  %v1601_v36 = vld [vmem:[%s2057_s11 + $0x38] sm:$0xff]  }
 0x4f0   : > { %v945_v42 = vmul.f32 %v1619_v40, %v1609_v13 }
 0x4f1   : > { %v829_v39 = vpack.c.bf16 %v828_v37, %v828_v37  ;;  %v1389_v37 = vld [vmem:[%s2056_s10] ss:$0 sm:$0xff] }
 0x4f2   : > { %v946_v43 = vpack.c.bf16 %v945_v42, %v945_v42 }
 0x4f3   : > { %1482 = vmatmul.mubr.msk.bf16.vlgmr.msra.gmra.mrb[16].mxu0 %vm540_vm2, %v829_v39 }
 0x4f4   : > { %1492 = vmatpush3.bf16.msra.mxu0 %v953_v41  ;;  %1493 = vmatprep.mubr.msk.bf16.mxu0 %vm1691_vm1, %v1690_v8 }
 0x4f5   : > { %1505 = vmatprep.subr.bf16.mxu0 %v1690_v8 }
 0x4fb   : > { %1494 = vmatmul.mubr.msk.bf16.vlgmr.msra.gmra.mrb[20].mxu0 %vm540_vm2, %v946_v43 }
 0x4fc   : > { %1509 = vmatprep.mubr.msk.bf16.mxu0 %vm1691_vm1, %v1690_v8 }
 0x591   : > { %v643_v44 = vpop.f32.mrb[8].mxu0 }
 0x592   : > { %649 = vst.msk [vmem:[#allocation2] sm:$0xff] %vm540_vm2, %v643_v44  ;;  %v1459_v45 = vpop.f32.mrb[9].mxu0 }
 0x593   : > { %v646_v46 = vpop.f32.mrb[10].mxu0 }
 0x594   : > { %v1460_v47 = vpop.f32.mrb[11].mxu0 }
 0x59e   : > { %v755_v48 = vpop.f32.mrb[12].mxu0 }
 0x59f   : > { %762 = vrot.lane.b32.xlu0 %v755_v48, %s1703_s22  ;;  %v1471_v49 = vpop.f32.mrb[13].mxu0  ;;  %s431_s22 = scalar_lea.vmem [#allocation3], %s1367_s15 }
 0x5a0   : > { %v758_v50 = vpop.f32.mrb[14].mxu0  ;;  %s1304_s23 = sshll.u32 %s431_s22, 4  ;;  %s2005_s23 = int_to_ptr.vmem [resolvable:$true] %s1304_s23 }
 0x5a1   : > { %v1472_v51 = vpop.f32.mrb[15].mxu0  ;;  %v1402_v50 = vld [vmem:[%s2058_s12] ss:$0 sm:$0xff]  ;;  %s1626_s15 = scalar_lea.vmem %s2005_s23, 128 }
 0x5a2   : > { %p1627_p11 = scmp.ne.s32.totalorder %s2005_s23, %s1626_s15 }
 0x5a4   : > { %p1628_p12 = pnand %p1627_p11, %p1815_p5 }
 0x5a6   : > { %p1629_p13 = pneg %p1628_p12 }
 0x5c6   : > { %v872_v54 = vpop.f32.mrb[16].mxu0 }
 0x5c7   : > { %879 = vrot.lane.b32.xlu1 %v872_v54, %s1704_s16  ;;  %v1483_v55 = vpop.f32.mrb[17].mxu0  ;;  %s1706_s16 = smov [#allocation3]  }
 0x5c8   : > { %v875_v56 = vpop.f32.mrb[18].mxu0 }
 0x5c9   : > { %v1484_v57 = vpop.f32.mrb[19].mxu0 }
 0x5ce   : > { %v989_v58 = vpop.f32.mrb[20].mxu0 }
 0x5cf   : > { %996 = vrot.lane.b32.xlu0 %v989_v58, %s1705_s20  ;;  %v1495_v59 = vpop.f32.mrb[21].mxu0  ;;  %s1630_s20 = sshll.u32 %s1706_s16, 4  ;;  %s1631_s20 = int_to_ptr.vmem [resolvable:$false] %s1630_s20 }
 0x5d0   : > { %v992_v60 = vpop.f32.mrb[22].mxu0  ;;  %s1632_s2 = scalar_lea.vmem %s1631_s20, 256  ;;  %p1633_p0 = scmp.lt.s32.totalorder %s2005_s23, %s1631_s20 }
 0x5d1   : > { %v1496_v61 = vpop.f32.mrb[23].mxu0  ;;  %p1634_p1 = scmp.lt.s32.totalorder %s1632_s2, %s1626_s15 }
 0x5d3   : > { %p1635_p2 = por %p1634_p1, %p1633_p0 }
 0x5d5   : > { %p1636_p3 = pnand %p1635_p2, %p1629_p13 }
 0x611   : > { %v763_v62 = vpop.permute.xlu0 %762 }
 0x612   : > { %766 = vst.msk [vmem:[#allocation2] sm:$0xff] %vm765_vm4, %v763_v62 }
 0x639   : > { %v880_v63 = vpop.permute.xlu1 %879 }
 0x63a   : > { %883 = vst.msk [vmem:[#allocation2] sm:$0xff] %vm882_vm5, %v880_v63 }
 0x641   : > { %v997_v1 = vpop.permute.xlu0 %996 }
 0x642   : > { %1000 = vst.msk [vmem:[#allocation2] sm:$0xff] %vm999_vm6, %v997_v1 }
 0x649   : > { %v1001_v2 = vld [vmem:[#allocation2] sm:$0xff] }
 0x64a   : > { %v1006_v3 = vpack.c.bf16 %v1001_v2, %v1001_v2 }
 0x64c   : > { %1502 = vmatmul.mubr.msk.bf16.vlgmr.msra.gmra.mrb[12].mxu1 %vm440_vm0, %v1006_v3 }
 0x64d   : > { %1529 = vmatprep.mubr.msk.bf16.mxu1 %vm1691_vm1, %v1690_v8  ;;  %1514 = vmatpush3.bf16.msra.mxu1 %v1594_v29 }
 0x64e   : > { %1515 = vmatprep.subr.bf16.mxu1 %v1690_v8 }
 0x651   : > { %1516 = vmatpush3.bf16.msra.mxu1 %v1595_v30 }
 0x652   : > { %1517 = vmatprep.subr.bf16.mxu1 %v1690_v8 }
 0x655   : > { %1518 = vmatpush3.bf16.msra.mxu1 %v1596_v31 }
 0x656   : > { %1519 = vmatprep.subr.bf16.mxu1 %v1690_v8 }
 0x659   : > { %1520 = vmatpush3.bf16.msra.mxu1 %v1597_v32 }
 0x65a   : > { %1521 = vmatprep.subr.bf16.mxu1 %v1690_v8 }
 0x65d   : > { %1522 = vmatpush3.bf16.msra.mxu1 %v1598_v33 }
 0x65e   : > { %1523 = vmatprep.subr.bf16.mxu1 %v1690_v8 }
 0x661   : > { %1524 = vmatpush3.bf16.msra.mxu1 %v1599_v34 }
 0x662   : > { %1525 = vmatprep.subr.bf16.mxu1 %v1690_v8 }
 0x665   : > { %1526 = vmatpush3.bf16.msra.mxu1 %v1600_v35 }
 0x666   : > { %1527 = vmatprep.subr.bf16.mxu1 %v1690_v8 }
 0x669   : > { %1528 = vmatpush3.bf16.msra.mxu1 %v1601_v36 }
 0x71f   : > { %v1056_v4 = vpop.f32.mrb[12].mxu1 }
 0x720   : > { %v1062_v6 = vadd.f32 %v1056_v4, %v1830_v0  ;;  %v1503_v7 = vpop.f32.mrb[13].mxu1  ;;  %v1592_v0 = vld [vmem:[%s2055_s9] sm:$0xff]  }
 0x721   : > { %v1059_v9 = vpop.f32.mrb[14].mxu1  ;;  %1506 = vmatpush3.bf16.msra.mxu0 %v1592_v0 }
 0x722   : > { %v1940_v10 = vadd.f32 %v1386_v5, %v1062_v6  ;;  %v1504_v11 = vpop.f32.mrb[15].mxu1  ;;  %1507 = vmatprep.subr.bf16.mxu0 %v1690_v8 }
 0x724   : > { %v1073_v12 = vsel %vm440_vm0, %v1940_v10, 0.0 }
 0x725   : > { %1074 = vadd.xlane.f32.xlu1 %v1073_v12  ;;  %1508 = vmatpush3.bf16.msra.mxu0 %v1593_v18 }
 0x7b2   : > { %v1075_v13 = vpop.xlane.xlu1 %1074 }
 0x7b3   : > { %v1076_v14 = vmul.f32 0.03125, %v1075_v13 }
 0x7b5   : > { %v1077_v15 = vsub.f32 %v1940_v10, %v1076_v14 }
 0x7b7   : > { %v1078_v16 = vmul.f32 %v1077_v15, %v1077_v15 }
 0x7b9   : > { %v1079_v17 = vsel %vm440_vm0, %v1078_v16, 0.0 }
 0x7ba   : > { %1080 = vadd.xlane.f32.xlu0 %v1079_v17 }
 0x847   : > { %v1081_v19 = vpop.xlane.xlu0 %1080 }
 0x848   : > { %v1082_v20 = vmul.f32 0.03125, %v1081_v19 }
 0x84a   : > { %v1083_v21 = vadd.f32 1e-12, %v1082_v20 }
 0x84c   : > { %1620 = vrsqrt.f32 %v1083_v21 }
 0x856   : > { %v1621_v22 = vpop.eup %1620 }
 0x857   : > { %v1085_v24 = vmul.f32 %v1621_v22, %v1077_v15 }
 0x859   : > { %v1092_v27 = vmul.f32 %v1387_v23, %v1085_v24 }
 0x85b   : > { %v1099_v25 = vadd.f32 %v1388_v26, %v1092_v27 }
 0x85d   : > { %v1104_v28 = vpack.c.bf16 %v1099_v25, %v1099_v25 }
 0x85f   : > { %1510 = vmatmul.mubr.msk.bf16.vlgmr.msra.gmra.mrb[24].mxu0 %vm440_vm0, %v1104_v28 }
 0x932   : > { %v1161_v38 = vpop.f32.mrb[24].mxu0 }
 0x933   : > { %v1162_v39 = vadd.f32 %v1389_v37, %v1161_v38  ;;  %v1511_v40 = vpop.f32.mrb[25].mxu0 }
 0x934   : > { %v1164_v41 = vpop.f32.mrb[26].mxu0 }
 0x935   : > { %v1393_v42 = vmul.f32 -1.702, %v1162_v39  ;;  %v1512_v43 = vpop.f32.mrb[27].mxu0 }
 0x937   : > { %v1169_v44 = vmul.f32 1.442695, %v1393_v42 }
 0x939   : > { %1622 = vpow2.f32 %v1169_v44 }
 0x943   : > { %v1623_v8 = vpop.eup %1622 }
 0x944   : > { %v1171_v45 = vadd.f32 1.0, %v1623_v8 }
 0x946   : > { %1624 = vrcp.f32 %v1171_v45 }
 0x950   : > { %v1625_v46 = vpop.eup %1624 }
 0x951   : > { %v1174_v47 = vmul.f32 %v1625_v46, %v1162_v39 }
 0x953   : > { %v1191_v48 = vpack.c.bf16 %v1174_v47, %v1174_v47 }
 0x955   : > { %1530 = vmatmul.mubr.bf16.vlgmr.msra.gmra.mrb[16].mxu1 %v1191_v48 }
 0xa28   : > { %v1274_v49 = vpop.f32.mrb[16].mxu1 }
 0xa29   : > { %v1280_v51 = vadd.f32 %v1274_v49, %v1940_v10  ;;  %v1531_v52 = vpop.f32.mrb[17].mxu1 }
 0xa2a   : > { %v1277_v53 = vpop.f32.mrb[18].mxu1 }
 0xa2b   : > { %v1288_v54 = vadd.f32 %v1402_v50, %v1280_v51  ;;  %v1532_v55 = vpop.f32.mrb[19].mxu1 }
 0xa2d   : > { %1289 = vst.msk [vmem:[%s431_s22] sm:$0xff] %vm440_vm0, %v1288_v54 }
 0xa2e   : > { %1639 = shalt.err (!%p1636_p3)
}
 0xa2f   : > { %s1640_s0 = scalar_lea.hbm %s2003_s1, 128  ;;  %s1644_s22 = scalar_lea.hbm %s2059_s13, 256 }
 0xa30   : > { %p1641_p4 = scmp.ne.s32.totalorder %s2003_s1, %s1640_s0  ;;  %p1645_p9 = scmp.lt.u32.totalorder %s2003_s1, %s2059_s13 }
 0xa31   : > { %p1646_p10 = scmp.lt.u32.totalorder %s1644_s22, %s1640_s0  ;;  %p1648_p12 = scmp.lt.u32.totalorder %s1640_s0, %s2003_s1 }
 0xa32   : > { %p1642_p7 = pnand %p1641_p4, %p1815_p5 }
 0xa33   : > { %p1647_p11 = por %p1646_p10, %p1645_p9 }
 0xa34   : > { %p1643_p8 = pneg %p1642_p7 }
 0xa35   : > { %p1649_p13 = por %p1648_p12, %p1647_p11 }
 0xa37   : > { %p1650_p0 = pnand %p1649_p13, %p1643_p8 }
 0xa39   : > { %1653 = shalt.err (!%p1650_p0)
}
 0xa3a   : > { %1533 = dma.vmem_to_hbm [thread:$0]  (%p1815_p5), %s2005_s23, 128, %s2003_s1, %s1291_s29  }
 0xa3b PF: > { %p1539_p1 = scmp.ge.s32.totalorder %s1688_s28, 2  ;;  %s1316_s2 = sand.u32 1, %s1676_s25  }
 0xa3c   : > { %s1317_s15 = scalar_lea.sflag [#allocation4], %s1316_s2 }
 0xa3d   : > { %p1536_p2 = pnand %p1539_p1, %p1819_p6 }
 0xa3f   : > { %1671 = dma.done.wait (!%p1536_p2), %s1317_s15, 128  }
 0xa40   : > { %1673 = vsyncadd (!%p1536_p2), %s1317_s15, 4294967168  ;;  %p23_p3 = scmp.ge.s32.totalorder %s1802_s14, 4   ;;  %s2068_s25 = smov %s1680_s26 }
 0xa41   : > { %s2069_s26 = smov %s1684_s27  ;;  %s2070_s27 = smov %s1813_s17 }
 0xa42   : > { %s2071_s28 = smov %s1802_s14  ;;  %25 = sbr.rel (!%p23_p3) target bundleno = 7 (0x7), region = 107 }
 0xa49   :  { %1322 = vsyncpa [#allocation4], 1 }
 0xa4a   :  { %1324 = vsyncpa [#allocation4 + $0x1], 1 }

</bundles_post_ra>
